<compile_context>
chip_gen: v5e
topology: v5e:2x2
jax: 0.10.0
libtpu: 0.0.40
codegen_flags: <defaults>
</compile_context>

<pallas_src>
import functools

import jax
import jax.numpy as jnp
from jax.experimental import pallas as pl
from jax.experimental.pallas import tpu as pltpu

D_IN, D1, D2, D3 = 28 * 28, 128, 64, 10
D3_PAD = 128  # lane-dense slab for the 10-wide bottleneck / a3 output


def _sae_kernel(x_ref,
                w1_ref, b1_ref, w2_ref, b2_ref, w3_ref, b3_ref,
                v3_ref, c3_ref, v2_ref, c2_ref, v1_ref, c1_ref,
                y_ref, xr_ref):
    # One batch tile per grid step; all six layers chained in VMEM, no HBM round
    # trips for intermediates. Matmul operands are bf16 (MXU-native); accumulation,
    # bias add and tanh stay in f32 (v5e has no bf16 VPU/EUP).
    def layer(a_bf16, w_ref, b_ref):
        z = jnp.dot(a_bf16, w_ref[...], preferred_element_type=jnp.float32) + b_ref[...]
        return jnp.tanh(z)

    a1 = layer(x_ref[...], w1_ref, b1_ref)
    a2 = layer(a1.astype(jnp.bfloat16), w2_ref, b2_ref)
    # w3/b3 are zero-padded to 128 output lanes -> a3p[:, 10:] == tanh(0) == 0.
    a3p = layer(a2.astype(jnp.bfloat16), w3_ref, b3_ref)
    # v3 rows 10..127 are zero, so the padded lanes contribute nothing.
    r2 = layer(a3p.astype(jnp.bfloat16), v3_ref, c3_ref)
    r1 = layer(r2.astype(jnp.bfloat16), v2_ref, c2_ref)
    xr = layer(r1.astype(jnp.bfloat16), v1_ref, c1_ref)

    y_ref[...] = a3p.astype(y_ref.dtype)     # lane-dense (128-wide) store
    xr_ref[...] = xr.astype(xr_ref.dtype)


def _const_spec(shape):
    nd = len(shape)
    return pl.BlockSpec(shape, lambda i, _nd=nd: (0,) * _nd)


def _round_up(n, m):
    return (n + m - 1) // m * m


def prepare_params(params):
    """Pack PyTorch-layout params ([out, in] weights, [out] biases) ONCE:
    transpose to [in, out], cast weights to bf16, zero-pad the 10-wide
    bottleneck to 128 lanes. Call outside the forward path."""
    f32, bf16 = jnp.float32, jnp.bfloat16

    def wt(w):  # [out, in] -> [in, out], bf16 for the MXU
        return jnp.asarray(w, f32).T.astype(bf16)

    def bias(b, pad_to=None):
        b = jnp.asarray(b, f32).reshape(1, -1)
        if pad_to is not None:
            b = jnp.pad(b, ((0, 0), (0, pad_to - b.shape[1])))
        return b

    w3p = jnp.pad(jnp.asarray(params["w3"], f32).T, ((0, 0), (0, D3_PAD - D3))).astype(bf16)
    v3p = jnp.pad(jnp.asarray(params["v3"], f32).T, ((0, D3_PAD - D3), (0, 0))).astype(bf16)

    return dict(
        w1=wt(params["w1"]), b1=bias(params["b1"]),
        w2=wt(params["w2"]), b2=bias(params["b2"]),
        w3=w3p, b3=bias(params["b3"], D3_PAD),
        v3=v3p, c3=bias(params["c3"]),
        v2=wt(params["v2"]), c2=bias(params["c2"]),
        v1=wt(params["v1"]), c1=bias(params["c1"]),
    )


@functools.partial(jax.jit, static_argnames=("tile_b",))
def stacked_autoencoder_forward(x, packed, tile_b=512):
    """x: [B, 784] float32. packed: output of prepare_params.
    Returns (a3 [B, 10], xr [B, 784]) in float32."""
    B = x.shape[0]
    # bf16 x blocks -> keep the batch tile a multiple of 16 sublanes.
    tb = min(_round_up(tile_b, 16), _round_up(B, 16))
    Bp = _round_up(B, tb)

    xb = x.astype(jnp.bfloat16)
    if Bp != B:
        xb = jnp.pad(xb, ((0, Bp - B), (0, 0)))

    p = packed
    weights = (p["w1"], p["b1"], p["w2"], p["b2"], p["w3"], p["b3"],
               p["v3"], p["c3"], p["v2"], p["c2"], p["v1"], p["c1"])

    in_specs = [pl.BlockSpec((tb, D_IN), lambda i: (i, 0))]           # streamed x tile
    in_specs += [_const_spec(w.shape) for w in weights]               # resident weights
    out_specs = [pl.BlockSpec((tb, D3_PAD), lambda i: (i, 0)),        # lane-dense a3 slab
                 pl.BlockSpec((tb, D_IN), lambda i: (i, 0))]          # xr tile

    a3p, xr = pl.pallas_call(
        _sae_kernel,
        out_shape=(jax.ShapeDtypeStruct((Bp, D3_PAD), jnp.float32),
                   jax.ShapeDtypeStruct((Bp, D_IN), jnp.float32)),
        grid_spec=pltpu.PrefetchScalarGridSpec(
            num_scalar_prefetch=0,
            grid=(Bp // tb,),
            in_specs=in_specs,
            out_specs=out_specs,
        ),
        compiler_params=pltpu.CompilerParams(
            dimension_semantics=("parallel",)),   # megacore-shard the batch axis
    )(xb, *weights)

    return a3p[:B, :D3], xr[:B, :]


def _init_linear(key, out_features, in_features):
    # PyTorch nn.Linear default init: U(-1/sqrt(in), 1/sqrt(in)) for W and b.
    kw, kb = jax.random.split(key)
    bound = 1.0 / jnp.sqrt(jnp.float32(in_features))
    w = jax.random.uniform(kw, (out_features, in_features), jnp.float32, -bound, bound)
    b = jax.random.uniform(kb, (out_features,), jnp.float32, -bound, bound)
    return w, b


def make_params(key):
    keys = jax.random.split(key, 6)
    w1, b1 = _init_linear(keys[0], D1, D_IN)   # ae1.forward_pass
    w2, b2 = _init_linear(keys[1], D2, D1)     # ae2.forward_pass
    w3, b3 = _init_linear(keys[2], D3, D2)     # ae3.forward_pass
    v1, c1 = _init_linear(keys[3], D_IN, D1)   # ae1.backward_pass
    v2, c2 = _init_linear(keys[4], D1, D2)     # ae2.backward_pass
    v3, c3 = _init_linear(keys[5], D2, D3)     # ae3.backward_pass
    return dict(w1=w1, b1=b1, w2=w2, b2=b2, w3=w3, b3=b3,
                v1=v1, c1=c1, v2=v2, c2=c2, v3=v3, c3=c3)


def _reference_forward(x, p):
    a1 = jnp.tanh(x @ p["w1"].T + p["b1"])
    a2 = jnp.tanh(a1 @ p["w2"].T + p["b2"])
    a3 = jnp.tanh(a2 @ p["w3"].T + p["b3"])
    r2 = jnp.tanh(a3 @ p["v3"].T + p["c3"])
    r1 = jnp.tanh(r2 @ p["v2"].T + p["c2"])
    xr = jnp.tanh(r1 @ p["v1"].T + p["c1"])
    return a3, xr


if __name__ == "__main__":
    key = jax.random.PRNGKey(0)
    kx, kp = jax.random.split(key)

    params = make_params(kp)
    packed = prepare_params(params)   # transposes/casts hoisted out of the forward path

    # (B, tile_b): single-tile case and a multi-tile case with batch padding.
    for B, tb in ((8, 512), (40, 16)):
        x = jax.random.normal(jax.random.fold_in(kx, B), (B, D_IN), jnp.float32)
        a3, xr = stacked_autoencoder_forward(x, packed, tile_b=tb)
        a3 = jax.block_until_ready(a3)
        xr = jax.block_until_ready(xr)

        ref_a3, ref_xr = _reference_forward(x, params)
        assert a3.shape == (B, D3) and xr.shape == (B, D_IN)
        # bf16 MXU operands vs. pure-f32 reference -> modest tolerance.
        assert jnp.allclose(a3, ref_a3, atol=2e-2, rtol=2e-2), \
            float(jnp.max(jnp.abs(a3 - ref_a3)))
        assert jnp.allclose(xr, ref_xr, atol=2e-2, rtol=2e-2), \
            float(jnp.max(jnp.abs(xr - ref_xr)))

    print("KERNEL_OK")
</pallas_src>

<mosaic_0001>
module attributes {stable_mosaic.version = 11 : i64} {
  func.func @_sae_kernel(%arg0: i32, %arg1: memref<16x784xbf16, #tpu.memory_space<vmem>>, %arg2: memref<784x128xbf16, #tpu.memory_space<vmem>>, %arg3: memref<1x128xf32, #tpu.memory_space<vmem>>, %arg4: memref<128x64xbf16, #tpu.memory_space<vmem>>, %arg5: memref<1x64xf32, #tpu.memory_space<vmem>>, %arg6: memref<64x128xbf16, #tpu.memory_space<vmem>>, %arg7: memref<1x128xf32, #tpu.memory_space<vmem>>, %arg8: memref<128x64xbf16, #tpu.memory_space<vmem>>, %arg9: memref<1x64xf32, #tpu.memory_space<vmem>>, %arg10: memref<64x128xbf16, #tpu.memory_space<vmem>>, %arg11: memref<1x128xf32, #tpu.memory_space<vmem>>, %arg12: memref<128x784xbf16, #tpu.memory_space<vmem>>, %arg13: memref<1x784xf32, #tpu.memory_space<vmem>>, %arg14: memref<16x128xf32, #tpu.memory_space<vmem>>, %arg15: memref<16x784xf32, #tpu.memory_space<vmem>>) attributes {dimension_semantics = [#tpu.dimension_semantics<parallel>], iteration_bounds = array<i64: 1>, scalar_prefetch = 0 : i64, scratch_operands = 0 : i64, tpu.core_type = #tpu.core_type<tc>, window_params = [{transform_indices = @transform_0, window_bounds = array<i64: 16, 784>}, {pipeline_mode = #tpu.pipeline_mode<synchronous>, transform_indices = @transform_1, window_bounds = array<i64: 784, 128>}, {pipeline_mode = #tpu.pipeline_mode<synchronous>, transform_indices = @transform_2, window_bounds = array<i64: 1, 128>}, {pipeline_mode = #tpu.pipeline_mode<synchronous>, transform_indices = @transform_3, window_bounds = array<i64: 128, 64>}, {pipeline_mode = #tpu.pipeline_mode<synchronous>, transform_indices = @transform_4, window_bounds = array<i64: 1, 64>}, {pipeline_mode = #tpu.pipeline_mode<synchronous>, transform_indices = @transform_5, window_bounds = array<i64: 64, 128>}, {pipeline_mode = #tpu.pipeline_mode<synchronous>, transform_indices = @transform_6, window_bounds = array<i64: 1, 128>}, {pipeline_mode = #tpu.pipeline_mode<synchronous>, transform_indices = @transform_7, window_bounds = array<i64: 128, 64>}, {pipeline_mode = #tpu.pipeline_mode<synchronous>, transform_indices = @transform_8, window_bounds = array<i64: 1, 64>}, {pipeline_mode = #tpu.pipeline_mode<synchronous>, transform_indices = @transform_9, window_bounds = array<i64: 64, 128>}, {pipeline_mode = #tpu.pipeline_mode<synchronous>, transform_indices = @transform_10, window_bounds = array<i64: 1, 128>}, {pipeline_mode = #tpu.pipeline_mode<synchronous>, transform_indices = @transform_11, window_bounds = array<i64: 128, 784>}, {pipeline_mode = #tpu.pipeline_mode<synchronous>, transform_indices = @transform_12, window_bounds = array<i64: 1, 784>}, {transform_indices = @transform_13, window_bounds = array<i64: 16, 128>}, {transform_indices = @transform_14, window_bounds = array<i64: 16, 784>}]} {
    %c0 = arith.constant 0 : index
    %c0_0 = arith.constant 0 : index
    %0 = vector.load %arg1[%c0, %c0_0] : memref<16x784xbf16, #tpu.memory_space<vmem>>, vector<16x784xbf16>
    %c0_1 = arith.constant 0 : index
    %c0_2 = arith.constant 0 : index
    %1 = vector.load %arg2[%c0_1, %c0_2] : memref<784x128xbf16, #tpu.memory_space<vmem>>, vector<784x128xbf16>
    %cst = arith.constant dense<0.000000e+00> : vector<16x128xf32>
    %2 = tpu.matmul %0, %1, %cst {dimension_numbers = #tpu.dot_dimension_numbers<[1], [0], [0], [1], [0, 0, 1, 1], [], []>} : vector<16x784xbf16>, vector<784x128xbf16>, vector<16x128xf32> -> vector<16x128xf32>
    %c0_3 = arith.constant 0 : index
    %c0_4 = arith.constant 0 : index
    %3 = vector.load %arg3[%c0_3, %c0_4] : memref<1x128xf32, #tpu.memory_space<vmem>>, vector<1x128xf32>
    %4 = vector.broadcast %3 : vector<1x128xf32> to vector<16x128xf32>
    %5 = arith.addf %2, %4 : vector<16x128xf32>
    %6 = math.tanh %5 : vector<16x128xf32>
    %7 = arith.truncf %6 : vector<16x128xf32> to vector<16x128xbf16>
    %c0_5 = arith.constant 0 : index
    %c0_6 = arith.constant 0 : index
    %8 = vector.load %arg4[%c0_5, %c0_6] : memref<128x64xbf16, #tpu.memory_space<vmem>>, vector<128x64xbf16>
    %cst_7 = arith.constant dense<0.000000e+00> : vector<16x64xf32>
    %9 = tpu.matmul %7, %8, %cst_7 {dimension_numbers = #tpu.dot_dimension_numbers<[1], [0], [0], [1], [0, 0, 1, 1], [], []>} : vector<16x128xbf16>, vector<128x64xbf16>, vector<16x64xf32> -> vector<16x64xf32>
    %c0_8 = arith.constant 0 : index
    %c0_9 = arith.constant 0 : index
    %10 = vector.load %arg5[%c0_8, %c0_9] : memref<1x64xf32, #tpu.memory_space<vmem>>, vector<1x64xf32>
    %11 = vector.broadcast %10 : vector<1x64xf32> to vector<16x64xf32>
    %12 = arith.addf %9, %11 : vector<16x64xf32>
    %13 = math.tanh %12 : vector<16x64xf32>
    %14 = arith.truncf %13 : vector<16x64xf32> to vector<16x64xbf16>
    %c0_10 = arith.constant 0 : index
    %c0_11 = arith.constant 0 : index
    %15 = vector.load %arg6[%c0_10, %c0_11] : memref<64x128xbf16, #tpu.memory_space<vmem>>, vector<64x128xbf16>
    %cst_12 = arith.constant dense<0.000000e+00> : vector<16x128xf32>
    %16 = tpu.matmul %14, %15, %cst_12 {dimension_numbers = #tpu.dot_dimension_numbers<[1], [0], [0], [1], [0, 0, 1, 1], [], []>} : vector<16x64xbf16>, vector<64x128xbf16>, vector<16x128xf32> -> vector<16x128xf32>
    %c0_13 = arith.constant 0 : index
    %c0_14 = arith.constant 0 : index
    %17 = vector.load %arg7[%c0_13, %c0_14] : memref<1x128xf32, #tpu.memory_space<vmem>>, vector<1x128xf32>
    %18 = vector.broadcast %17 : vector<1x128xf32> to vector<16x128xf32>
    %19 = arith.addf %16, %18 : vector<16x128xf32>
    %20 = math.tanh %19 : vector<16x128xf32>
    %21 = arith.truncf %20 : vector<16x128xf32> to vector<16x128xbf16>
    %c0_15 = arith.constant 0 : index
    %c0_16 = arith.constant 0 : index
    %22 = vector.load %arg8[%c0_15, %c0_16] : memref<128x64xbf16, #tpu.memory_space<vmem>>, vector<128x64xbf16>
    %cst_17 = arith.constant dense<0.000000e+00> : vector<16x64xf32>
    %23 = tpu.matmul %21, %22, %cst_17 {dimension_numbers = #tpu.dot_dimension_numbers<[1], [0], [0], [1], [0, 0, 1, 1], [], []>} : vector<16x128xbf16>, vector<128x64xbf16>, vector<16x64xf32> -> vector<16x64xf32>
    %c0_18 = arith.constant 0 : index
    %c0_19 = arith.constant 0 : index
    %24 = vector.load %arg9[%c0_18, %c0_19] : memref<1x64xf32, #tpu.memory_space<vmem>>, vector<1x64xf32>
    %25 = vector.broadcast %24 : vector<1x64xf32> to vector<16x64xf32>
    %26 = arith.addf %23, %25 : vector<16x64xf32>
    %27 = math.tanh %26 : vector<16x64xf32>
    %28 = arith.truncf %27 : vector<16x64xf32> to vector<16x64xbf16>
    %c0_20 = arith.constant 0 : index
    %c0_21 = arith.constant 0 : index
    %29 = vector.load %arg10[%c0_20, %c0_21] : memref<64x128xbf16, #tpu.memory_space<vmem>>, vector<64x128xbf16>
    %cst_22 = arith.constant dense<0.000000e+00> : vector<16x128xf32>
    %30 = tpu.matmul %28, %29, %cst_22 {dimension_numbers = #tpu.dot_dimension_numbers<[1], [0], [0], [1], [0, 0, 1, 1], [], []>} : vector<16x64xbf16>, vector<64x128xbf16>, vector<16x128xf32> -> vector<16x128xf32>
    %c0_23 = arith.constant 0 : index
    %c0_24 = arith.constant 0 : index
    %31 = vector.load %arg11[%c0_23, %c0_24] : memref<1x128xf32, #tpu.memory_space<vmem>>, vector<1x128xf32>
    %32 = vector.broadcast %31 : vector<1x128xf32> to vector<16x128xf32>
    %33 = arith.addf %30, %32 : vector<16x128xf32>
    %34 = math.tanh %33 : vector<16x128xf32>
    %35 = arith.truncf %34 : vector<16x128xf32> to vector<16x128xbf16>
    %c0_25 = arith.constant 0 : index
    %c0_26 = arith.constant 0 : index
    %36 = vector.load %arg12[%c0_25, %c0_26] : memref<128x784xbf16, #tpu.memory_space<vmem>>, vector<128x784xbf16>
    %cst_27 = arith.constant dense<0.000000e+00> : vector<16x784xf32>
    %37 = tpu.matmul %35, %36, %cst_27 {dimension_numbers = #tpu.dot_dimension_numbers<[1], [0], [0], [1], [0, 0, 1, 1], [], []>} : vector<16x128xbf16>, vector<128x784xbf16>, vector<16x784xf32> -> vector<16x784xf32>
    %c0_28 = arith.constant 0 : index
    %c0_29 = arith.constant 0 : index
    %38 = vector.load %arg13[%c0_28, %c0_29] : memref<1x784xf32, #tpu.memory_space<vmem>>, vector<1x784xf32>
    %39 = vector.broadcast %38 : vector<1x784xf32> to vector<16x784xf32>
    %40 = arith.addf %37, %39 : vector<16x784xf32>
    %41 = math.tanh %40 : vector<16x784xf32>
    %c0_30 = arith.constant 0 : index
    %c0_31 = arith.constant 0 : index
    %42 = vector.load %arg14[%c0_30, %c0_31] : memref<16x128xf32, #tpu.memory_space<vmem>>, vector<16x128xf32>
    tpu.vector_store %arg14[%c0_30, %c0_31], %20 {strides = array<i32>} : memref<16x128xf32, #tpu.memory_space<vmem>>, vector<16x128xf32>,
    %c0_32 = arith.constant 0 : index
    %c0_33 = arith.constant 0 : index
    %43 = vector.load %arg15[%c0_32, %c0_33] : memref<16x784xf32, #tpu.memory_space<vmem>>, vector<16x784xf32>
    tpu.vector_store %arg15[%c0_32, %c0_33], %41 {strides = array<i32>} : memref<16x784xf32, #tpu.memory_space<vmem>>, vector<16x784xf32>,
    return
  }
  func.func @transform_0(%arg0: i32) -> (i32, i32) {
    %c0_i32 = arith.constant 0 : i32
    %c0_i32_0 = arith.constant 0 : i32
    return %arg0, %c0_i32 : i32, i32
  }
  func.func @transform_1(%arg0: i32) -> (i32, i32) {
    %c0_i32 = arith.constant 0 : i32
    %c0_i32_0 = arith.constant 0 : i32
    %c0_i32_1 = arith.constant 0 : i32
    return %c0_i32, %c0_i32_0 : i32, i32
  }
  func.func @transform_2(%arg0: i32) -> (i32, i32) {
    %c0_i32 = arith.constant 0 : i32
    %c0_i32_0 = arith.constant 0 : i32
    %c0_i32_1 = arith.constant 0 : i32
    return %c0_i32, %c0_i32_0 : i32, i32
  }
  func.func @transform_3(%arg0: i32) -> (i32, i32) {
    %c0_i32 = arith.constant 0 : i32
    %c0_i32_0 = arith.constant 0 : i32
    %c0_i32_1 = arith.constant 0 : i32
    return %c0_i32, %c0_i32_0 : i32, i32
  }
  func.func @transform_4(%arg0: i32) -> (i32, i32) {
    %c0_i32 = arith.constant 0 : i32
    %c0_i32_0 = arith.constant 0 : i32
    %c0_i32_1 = arith.constant 0 : i32
    return %c0_i32, %c0_i32_0 : i32, i32
  }
  func.func @transform_5(%arg0: i32) -> (i32, i32) {
    %c0_i32 = arith.constant 0 : i32
    %c0_i32_0 = arith.constant 0 : i32
    %c0_i32_1 = arith.constant 0 : i32
    return %c0_i32, %c0_i32_0 : i32, i32
  }
  func.func @transform_6(%arg0: i32) -> (i32, i32) {
    %c0_i32 = arith.constant 0 : i32
    %c0_i32_0 = arith.constant 0 : i32
    %c0_i32_1 = arith.constant 0 : i32
    return %c0_i32, %c0_i32_0 : i32, i32
  }
  func.func @transform_7(%arg0: i32) -> (i32, i32) {
    %c0_i32 = arith.constant 0 : i32
    %c0_i32_0 = arith.constant 0 : i32
    %c0_i32_1 = arith.constant 0 : i32
    return %c0_i32, %c0_i32_0 : i32, i32
  }
  func.func @transform_8(%arg0: i32) -> (i32, i32) {
    %c0_i32 = arith.constant 0 : i32
    %c0_i32_0 = arith.constant 0 : i32
    %c0_i32_1 = arith.constant 0 : i32
    return %c0_i32, %c0_i32_0 : i32, i32
  }
  func.func @transform_9(%arg0: i32) -> (i32, i32) {
    %c0_i32 = arith.constant 0 : i32
    %c0_i32_0 = arith.constant 0 : i32
    %c0_i32_1 = arith.constant 0 : i32
    return %c0_i32, %c0_i32_0 : i32, i32
  }
  func.func @transform_10(%arg0: i32) -> (i32, i32) {
    %c0_i32 = arith.constant 0 : i32
    %c0_i32_0 = arith.constant 0 : i32
    %c0_i32_1 = arith.constant 0 : i32
    return %c0_i32, %c0_i32_0 : i32, i32
  }
  func.func @transform_11(%arg0: i32) -> (i32, i32) {
    %c0_i32 = arith.constant 0 : i32
    %c0_i32_0 = arith.constant 0 : i32
    %c0_i32_1 = arith.constant 0 : i32
    return %c0_i32, %c0_i32_0 : i32, i32
  }
  func.func @transform_12(%arg0: i32) -> (i32, i32) {
    %c0_i32 = arith.constant 0 : i32
    %c0_i32_0 = arith.constant 0 : i32
    %c0_i32_1 = arith.constant 0 : i32
    return %c0_i32, %c0_i32_0 : i32, i32
  }
  func.func @transform_13(%arg0: i32) -> (i32, i32) {
    %c0_i32 = arith.constant 0 : i32
    %c0_i32_0 = arith.constant 0 : i32
    return %arg0, %c0_i32 : i32, i32
  }
  func.func @transform_14(%arg0: i32) -> (i32, i32) {
    %c0_i32 = arith.constant 0 : i32
    %c0_i32_0 = arith.constant 0 : i32
    return %arg0, %c0_i32 : i32, i32
  }
}

</mosaic_0001>

<bundles_post_ra>
// kernel: stacked_autoencoder_forward.1
= control target key start
LH: loop header
LB: loop body
LE: loop exit
PB: predicated region body
PF: predicated region fallthrough
CT: control target
= control target key end

     0   :  { %vm486_vm0 = vcmask 130048   ;;  %vm712_vm1 = vcmask 523264   ;;  %s2866_s1 = inlined_call_operand.vmem [shape: bf16[784,128], index: 1, kind: input, shape index: {}]   ;;  %s2867_s2 = inlined_call_operand.vmem [shape: f32[1,128], index: 2, kind: input, shape index: {}]   ;;  %s2868_s0 = inlined_call_operand.vmem [shape: bf16[16,784], index: 0, kind: input, shape index: {}]   ;;  %s2869_s4 = inlined_call_operand.vmem [shape: f32[1,64], index: 4, kind: input, shape index: {}]   ;;  %s2870_s3 = inlined_call_operand.vmem [shape: bf16[128,64], index: 3, kind: input, shape index: {}]   ;;  %s2871_s6 = inlined_call_operand.vmem [shape: f32[1,128], index: 6, kind: input, shape index: {}]   ;;  %s2872_s5 = inlined_call_operand.vmem [shape: bf16[64,128], index: 5, kind: input, shape index: {}]   ;;  %s2873_s7 = inlined_call_operand.vmem [shape: bf16[128,64], index: 7, kind: input, shape index: {}]   ;;  %s2874_s8 = inlined_call_operand.vmem [shape: f32[1,64], index: 8, kind: input, shape index: {}]   ;;  %s2875_s13 = inlined_call_operand.vmem [shape: f32[16,128], index: 13, kind: output, shape index: {0}]   ;;  %s2876_s10 = inlined_call_operand.vmem [shape: f32[1,128], index: 10, kind: input, shape index: {}]   ;;  %s2877_s9 = inlined_call_operand.vmem [shape: bf16[64,128], index: 9, kind: input, shape index: {}]   ;;  %s2878_s11 = inlined_call_operand.vmem [shape: bf16[128,784], index: 11, kind: input, shape index: {}]   ;;  %s2879_s12 = inlined_call_operand.vmem [shape: f32[1,784], index: 12, kind: input, shape index: {}]   ;;  %s2880_s14 = inlined_call_operand.vmem [shape: f32[16,784], index: 14, kind: output, shape index: {1}]  }
   0x1   :  { %v1939_v0 = vld [vmem:[%s2866_s1 + $0x38] sm:$0xff]  ;;  %v1938_v4 = vld [vmem:[%s2866_s1 + $0x30] sm:$0xff]  ;;  %v1937_v8 = vld [vmem:[%s2866_s1 + $0x28] sm:$0xff] }
   0x2   :  { %v1947_v1 = vld [vmem:[%s2866_s1 + $0x78] sm:$0xff]  ;;  %490 = vmatpush.bf16.msra.mxu0 %v1939_v0  ;;  %v1946_v5 = vld [vmem:[%s2866_s1 + $0x70] sm:$0xff]  ;;  %v1945_v9 = vld [vmem:[%s2866_s1 + $0x68] sm:$0xff] }
   0x3   :  { %v1955_v2 = vld [vmem:[%s2866_s1 + $0xb8] sm:$0xff]  ;;  %504 = vmatpush.bf16.msra.mxu1 %v1947_v1  ;;  %v1954_v6 = vld [vmem:[%s2866_s1 + $0xb0] sm:$0xff]  ;;  %v1953_v10 = vld [vmem:[%s2866_s1 + $0xa8] sm:$0xff] }
   0x4   :  { %v1963_v3 = vld [vmem:[%s2866_s1 + $0xf8] sm:$0xff]  ;;  %518 = vmatpush.bf16.msra.mxu2 %v1955_v2  ;;  %v1962_v7 = vld [vmem:[%s2866_s1 + $0xf0] sm:$0xff]  ;;  %v1961_v11 = vld [vmem:[%s2866_s1 + $0xe8] sm:$0xff] }
   0x5   :  { %532 = vmatpush.bf16.msra.mxu3 %v1963_v3  ;;  %v1936_v12 = vld [vmem:[%s2866_s1 + $0x20] sm:$0xff]  ;;  %v1935_v16 = vld [vmem:[%s2866_s1 + $0x18] sm:$0xff]  ;;  %v1934_v20 = vld [vmem:[%s2866_s1 + $0x10] sm:$0xff] }
   0x6   :  { %491 = vmatpush.bf16.msra.mxu0 %v1938_v4  ;;  %v1944_v13 = vld [vmem:[%s2866_s1 + $0x60] sm:$0xff]  ;;  %v1943_v17 = vld [vmem:[%s2866_s1 + $0x58] sm:$0xff]  ;;  %v1942_v21 = vld [vmem:[%s2866_s1 + $0x50] sm:$0xff] }
   0x7   :  { %505 = vmatpush.bf16.msra.mxu1 %v1946_v5  ;;  %v1952_v14 = vld [vmem:[%s2866_s1 + $0xa0] sm:$0xff]  ;;  %v1951_v18 = vld [vmem:[%s2866_s1 + $0x98] sm:$0xff]  ;;  %v1950_v22 = vld [vmem:[%s2866_s1 + $0x90] sm:$0xff] }
   0x8   :  { %519 = vmatpush.bf16.msra.mxu2 %v1954_v6  ;;  %v1960_v15 = vld [vmem:[%s2866_s1 + $0xe0] sm:$0xff]  ;;  %v1959_v19 = vld [vmem:[%s2866_s1 + $0xd8] sm:$0xff]  ;;  %v1958_v23 = vld [vmem:[%s2866_s1 + $0xd0] sm:$0xff] }
   0x9   :  { %533 = vmatpush.bf16.msra.mxu3 %v1962_v7  ;;  %v1933_v24 = vld [vmem:[%s2866_s1 + $0x8] sm:$0xff]  ;;  %v1932_v28 = vld [vmem:[%s2866_s1] sm:$0xff]  ;;  %v1928_v31 = vld [vmem:[%s2868_s0 + $0x18] sm:$0xf0] }
   0xa   :  { %492 = vmatpush.bf16.msra.mxu0 %v1937_v8  ;;  %v1941_v25 = vld [vmem:[%s2866_s1 + $0x48] sm:$0xff]  ;;  %v1940_v29 = vld [vmem:[%s2866_s1 + $0x40] sm:$0xff]  ;;  %v1971_v34 = vld [vmem:[%s2866_s1 + $0x138] sm:$0xff] }
   0xb   :  { %506 = vmatpush.bf16.msra.mxu1 %v1945_v9  ;;  %v1949_v26 = vld [vmem:[%s2866_s1 + $0x88] sm:$0xff]  ;;  %v1380_v30 = vld [vmem:[%s2868_s0] sm:$0xf]  ;;  %v1925_v32 = vld [vmem:[%s2868_s0 + $0x4] sm:$0xf] }
   0xc   :  { %520 = vmatpush.bf16.msra.mxu2 %v1953_v10  ;;  %v1957_v27 = vld [vmem:[%s2866_s1 + $0xc8] sm:$0xff]  ;;  %v1382_v33 = vld [vmem:[%s2868_s0 + $0x1c] sm:$0xf0]  ;;  %v1979_v35 = vld [vmem:[%s2866_s1 + $0x178] sm:$0xff]  ;;  %v1381_v40 = vor.u32 %v1928_v31, %v1380_v30 }
   0xd   :  { %534 = vmatpush.bf16.msra.mxu3 %v1961_v11  ;;  %v1948_v36 = vld [vmem:[%s2866_s1 + $0x80] sm:$0xff]  ;;  %v1388_v38 = vld [vmem:[%s2868_s0 + $0x8] sm:$0xf]  ;;  %v1926_v41 = vld [vmem:[%s2868_s0 + $0xc] sm:$0xf]  ;;  %v1385_v43 = vor.u32 %v1925_v32, %v1382_v33 }
   0xe   :  { %493 = vmatpush.bf16.msra.mxu0 %v1936_v12  ;;  %v1956_v37 = vld [vmem:[%s2866_s1 + $0xc0] sm:$0xff]  ;;  %v1390_v42 = vld [vmem:[%s2868_s0 + $0x24] sm:$0xf0]  ;;  %v1970_v45 = vld [vmem:[%s2866_s1 + $0x130] sm:$0xff] }
   0xf   :  { %507 = vmatpush.bf16.msra.mxu1 %v1944_v13  ;;  %v1929_v39 = vld [vmem:[%s2868_s0 + $0x20] sm:$0xf0]  ;;  %v1978_v46 = vld [vmem:[%s2866_s1 + $0x170] sm:$0xff]  ;;  %v1393_v48 = vor.u32 %v1926_v41, %v1390_v42  ;;  %v1969_v49 = vld [vmem:[%s2866_s1 + $0x128] sm:$0xff] }
  0x10   :  { %521 = vmatpush.bf16.msra.mxu2 %v1952_v14  ;;  %v1980_v44 = vld [vmem:[%s2866_s1 + $0x180] sm:$0xff]  ;;  %v1389_v47 = vor.u32 %v1929_v39, %v1388_v38  ;;  %v1977_v50 = vld [vmem:[%s2866_s1 + $0x168] sm:$0xff]  ;;  %v1967_v53 = vld [vmem:[%s2866_s1 + $0x118] sm:$0xff] }
  0x11   :  { %535 = vmatpush.bf16.msra.mxu3 %v1960_v15  ;;  %v1968_v51 = vld [vmem:[%s2866_s1 + $0x120] sm:$0xff]  ;;  %v1975_v54 = vld [vmem:[%s2866_s1 + $0x158] sm:$0xff]  ;;  %v1931_v56 = vld [vmem:[%s2868_s0 + $0x30] sm:$0xf0] }
  0x12   :  { %494 = vmatpush.bf16.msra.mxu0 %v1935_v16  ;;  %v1976_v52 = vld [vmem:[%s2866_s1 + $0x160] sm:$0xff]  ;;  %v1404_v55 = vld [vmem:[%s2868_s0 + $0x18] sm:$0xf]  ;;  %v1966_v57 = vld [vmem:[%s2866_s1 + $0x110] sm:$0xff] }
  0x13   :  { %508 = vmatpush.bf16.msra.mxu1 %v1943_v17  ;;  %v1974_v58 = vld [vmem:[%s2866_s1 + $0x150] sm:$0xff]  ;;  %v1405_v59 = vor.u32 %v1931_v56, %v1404_v55  ;;  %v1965_v60 = vld [vmem:[%s2866_s1 + $0x108] sm:$0xff]  ;;  %v1964_v62 = vld [vmem:[%s2866_s1 + $0x100] sm:$0xff] }
  0x14   :  { %522 = vmatpush.bf16.msra.mxu2 %v1951_v18  ;;  %v1973_v61 = vld [vmem:[%s2866_s1 + $0x148] sm:$0xff]  ;;  %v1972_v63 = vld [vmem:[%s2866_s1 + $0x140] sm:$0xff]  ;;  %v1396_v0 = vld [vmem:[%s2868_s0 + $0x10] sm:$0xf] }
  0x15   :  { %536 = vmatpush.bf16.msra.mxu3 %v1959_v19  ;;  %v1930_v1 = vld [vmem:[%s2868_s0 + $0x28] sm:$0xf0]  ;;  %v1927_v2 = vld [vmem:[%s2868_s0 + $0x14] sm:$0xf]  ;;  %v1398_v3 = vld [vmem:[%s2868_s0 + $0x2c] sm:$0xf0] }
  0x16   :  { %495 = vmatpush.bf16.msra.mxu0 %v1934_v20  ;;  %v1397_v4 = vor.u32 %v1930_v1, %v1396_v0  ;;  %v1401_v5 = vor.u32 %v1927_v2, %v1398_v3  ;;  %v1988_v6 = vld [vmem:[%s2870_s3 + $0x38] sm:$0xff]  ;;  %v1987_v7 = vld [vmem:[%s2870_s3 + $0x30] sm:$0xff]  ;;  %v1986_v8 = vld [vmem:[%s2870_s3 + $0x28] sm:$0xff] }
  0x17   :  { %509 = vmatpush.bf16.msra.mxu1 %v1942_v21  ;;  %v1985_v9 = vld [vmem:[%s2870_s3 + $0x20] sm:$0xff]  ;;  %v1984_v10 = vld [vmem:[%s2870_s3 + $0x18] sm:$0xff]  ;;  %v1983_v11 = vld [vmem:[%s2870_s3 + $0x10] sm:$0xff] }
  0x18   :  { %523 = vmatpush.bf16.msra.mxu2 %v1950_v22  ;;  %v1982_v15 = vld [vmem:[%s2870_s3 + $0x8] sm:$0xff]  ;;  %v2061_v16 = vld [vmem:[%s2867_s2] ss:$0 sm:$0xff] }
  0x19   :  { %537 = vmatpush.bf16.msra.mxu3 %v1958_v23  ;;  %v1981_v17 = vld [vmem:[%s2870_s3] sm:$0xff]  ;;  %v1994_v0 = vld [vmem:[%s2873_s7 + $0x8] sm:$0xff] }
  0x1a   :  { %496 = vmatpush.bf16.msra.mxu0 %v1933_v24  ;;  %v1993_v1 = vld [vmem:[%s2873_s7] sm:$0xff] }
  0x1b   :  { %510 = vmatpush.bf16.msra.mxu1 %v1941_v25  ;;  %v2063_v2 = vld [vmem:[%s2871_s6] ss:$0 sm:$0xff] }
  0x1c   :  { %524 = vmatpush.bf16.msra.mxu2 %v1949_v26 }
  0x1d   :  { %538 = vmatpush.bf16.msra.mxu3 %v1957_v27 }
  0x1e   :  { %497 = vmatpush.bf16.msra.mxu0 %v1932_v28 }
  0x1f   :  { %511 = vmatpush.bf16.msra.mxu1 %v1940_v29 }
  0x20   :  { %525 = vmatpush.bf16.msra.mxu2 %v1948_v36 }
  0x21   :  { %539 = vmatpush.bf16.msra.mxu3 %v1956_v37  ;;  %498 = vmatmul.bf16.vlgmr.msra.gmra.mxu0 %v1381_v40 }
  0x22   :  { %546 = vmatpush.bf16.msrb.mxu0 %v1971_v34  ;;  %512 = vmatmul.bf16.vlgmr.msra.gmra.mxu1 %v1385_v43 }
  0x23   :  { %560 = vmatpush.bf16.msrb.mxu1 %v1979_v35  ;;  %526 = vmatmul.bf16.vlgmr.msra.gmra.mxu2 %v1389_v47  ;;  %v1991_v47 = vld [vmem:[%s2872_s5 + $0x10] sm:$0xff] }
  0x24   :  { %581 = vmatpush.bf16.msrb.mxu2 %v1980_v44  ;;  %540 = vmatmul.bf16.vlgmr.msra.gmra.mxu3 %v1393_v48  ;;  %v1990_v48 = vld [vmem:[%s2872_s5 + $0x8] sm:$0xff] }
  0x25   :  { %659 = vmatpush.bf16.msrb.mxu3 %v1988_v6 }
  0x26   :  { %547 = vmatpush.bf16.msrb.mxu0 %v1970_v45 }
  0x27   :  { %561 = vmatpush.bf16.msrb.mxu1 %v1978_v46  ;;  %v1992_v46 = vld [vmem:[%s2872_s5 + $0x18] sm:$0xff] }
  0x28   :  { %720 = vmatpush.bf16.msra.mxu2 %v1992_v46  ;;  %v1817_v46 = vld [vmem:[%s2878_s11 + $0xfc] sm:$0xf0] }
  0x29   :  { %660 = vmatpush.bf16.msrb.mxu3 %v1987_v7 }
  0x2a   :  { %548 = vmatpush.bf16.msrb.mxu0 %v1969_v49  ;;  %v1989_v49 = vld [vmem:[%s2872_s5] sm:$0xff] }
  0x2b   :  { %562 = vmatpush.bf16.msrb.mxu1 %v1977_v50  ;;  %v2000_v50 = vld [vmem:[%s2873_s7 + $0x38] sm:$0xff] }
  0x2c   :  { %721 = vmatpush.bf16.msra.mxu2 %v1991_v47  ;;  %v1823_v47 = vld [vmem:[%s2878_s11 + $0xe8] sm:$0xf] }
  0x2d   :  { %661 = vmatpush.bf16.msrb.mxu3 %v1986_v8 }
  0x2e   :  { %549 = vmatpush.bf16.msrb.mxu0 %v1968_v51  ;;  %v1999_v51 = vld [vmem:[%s2873_s7 + $0x30] sm:$0xff] }
  0x2f   :  { %563 = vmatpush.bf16.msrb.mxu1 %v1976_v52  ;;  %v1998_v52 = vld [vmem:[%s2873_s7 + $0x28] sm:$0xff] }
  0x30   :  { %722 = vmatpush.bf16.msra.mxu2 %v1990_v48  ;;  %v2037_v48 = vld [vmem:[%s2878_s11 + $0x100] sm:$0xf0] }
  0x31   :  { %662 = vmatpush.bf16.msrb.mxu3 %v1985_v9 }
  0x32   :  { %550 = vmatpush.bf16.msrb.mxu0 %v1967_v53 }
  0x33   :  { %564 = vmatpush.bf16.msrb.mxu1 %v1975_v54  ;;  %1602 = vmatmul.msk.bf16.vlgmr.msrb.gmra.mxu2 %vm486_vm0, %v1405_v59  ;;  %v2062_v54 = vld [vmem:[%s2869_s4] ss:$0 sm:$0xff] }
  0x34   :  { %723 = vmatpush.bf16.msra.mxu2 %v1989_v49 }
  0x35   :  { %663 = vmatpush.bf16.msrb.mxu3 %v1984_v10  ;;  %v2004_v10 = vld [vmem:[%s2877_s9 + $0x18] sm:$0xff] }
  0x36   :  { %551 = vmatpush.bf16.msrb.mxu0 %v1966_v57 }
  0x37   :  { %565 = vmatpush.bf16.msrb.mxu1 %v1974_v58 }
  0x39   :  { %664 = vmatpush.bf16.msrb.mxu3 %v1983_v11  ;;  %v2003_v11 = vld [vmem:[%s2877_s9 + $0x10] sm:$0xff] }
  0x3a   :  { %552 = vmatpush.bf16.msrb.mxu0 %v1965_v60 }
  0x3b   :  { %566 = vmatpush.bf16.msrb.mxu1 %v1973_v61  ;;  %v1997_v61 = vld [vmem:[%s2873_s7 + $0x20] sm:$0xff] }
  0x3d   :  { %665 = vmatpush.bf16.msrb.mxu3 %v1982_v15  ;;  %v2057_v15 = vld [vmem:[%s2878_s11 + $0x1a0] sm:$0xf0] }
  0x3e   :  { %553 = vmatpush.bf16.msrb.mxu0 %v1964_v62  ;;  %v1996_v62 = vld [vmem:[%s2873_s7 + $0x18] sm:$0xff] }
  0x3f   :  { %567 = vmatpush.bf16.msrb.mxu1 %v1972_v63  ;;  %v1995_v63 = vld [vmem:[%s2873_s7 + $0x10] sm:$0xff] }
  0x41   :  { %554 = vmatmul.bf16.vlgmr.msrb.gmra.mxu0 %v1397_v4  ;;  %666 = vmatpush.bf16.msrb.mxu3 %v1981_v17 }
  0x42   :  { %568 = vmatmul.bf16.vlgmr.msrb.gmra.mxu1 %v1401_v5  ;;  %801 = vmatpush.bf16.msra.mxu0 %v2000_v50  ;;  %v2048_v50 = vld [vmem:[%s2878_s11 + $0x15c] sm:$0xf] }
  0x43   :  { %861 = vmatpush.bf16.msra.mxu1 %v2004_v10  ;;  %v1767_v10 = vld [vmem:[%s2878_s11 + $0x78] sm:$0xf] }
  0x46   :  { %802 = vmatpush.bf16.msra.mxu0 %v1999_v51 }
  0x47   :  { %862 = vmatpush.bf16.msra.mxu1 %v2003_v11  ;;  %v2023_v11 = vld [vmem:[%s2878_s11 + $0x90] sm:$0xf0] }
  0x4a   :  { %803 = vmatpush.bf16.msra.mxu0 %v1998_v52  ;;  %v1787_v52 = vld [vmem:[%s2878_s11 + $0xa8] sm:$0xf] }
  0x4e   :  { %804 = vmatpush.bf16.msra.mxu0 %v1997_v61 }
  0x52   :  { %805 = vmatpush.bf16.msra.mxu0 %v1996_v62  ;;  %v2030_v62 = vld [vmem:[%s2878_s11 + $0xc8] sm:$0xf0] }
  0x56   :  { %806 = vmatpush.bf16.msra.mxu0 %v1995_v63  ;;  %v2041_v63 = vld [vmem:[%s2878_s11 + $0x124] sm:$0xf] }
  0x5a   :  { %807 = vmatpush.bf16.msra.mxu0 %v1994_v0  ;;  %v1853_v0 = vld [vmem:[%s2878_s11 + $0x13c] sm:$0xf0] }
  0x5e   :  { %808 = vmatpush.bf16.msra.mxu0 %v1993_v1  ;;  %v2064_v1 = vld [vmem:[%s2874_s8] ss:$0 sm:$0xff] }
  0x9e   :  { %v499_v12 = vpop.f32.mrf.mxu0 }
  0x9f   :  { %v513_v13 = vpop.f32.mrf.mxu1  ;;  %v500_v18 = vadd.f32 %v2061_v16, %v499_v12  ;;  %v2002_v12 = vld [vmem:[%s2877_s9 + $0x8] sm:$0xff] }
  0xa0   :  { %863 = vmatpush.bf16.msra.mxu1 %v2002_v12 }
  0xa1   :  { %v514_v20 = vadd.f32 %v513_v13, %v500_v18  ;;  %v2001_v13 = vld [vmem:[%s2877_s9] sm:$0xff]  ;;  %v1901_v18 = vld [vmem:[%s2878_s11 + $0x1a4] sm:$0xf0] }
  0xa4   :  { %864 = vmatpush.bf16.msra.mxu1 %v2001_v13 }
  0xa6   :  { %v527_v14 = vpop.f32.mrf.mxu2  ;;  %v501_v19 = vpop.f32.mrf.mxu0 }
  0xa7   :  { %v515_v21 = vpop.f32.mrf.mxu1  ;;  %v541_v23 = vpop.f32.mrf.mxu3  ;;  %v502_v24 = vadd.f32 %v2061_v16, %v501_v19  ;;  %v528_v25 = vadd.f32 %v527_v14, %v514_v20  ;;  %v1899_v14 = vld [vmem:[%s2878_s11 + $0x188] sm:$0xf]  ;;  %v2054_v16 = vld [vmem:[%s2878_s11 + $0x18c] sm:$0xf]  ;;  %v1907_v19 = vld [vmem:[%s2878_s11 + $0x190] sm:$0xf] }
  0xa8   :  { %v1900_v17 = vor.u32 %v2057_v15, %v1899_v14  ;;  %v2058_v20 = vld [vmem:[%s2878_s11 + $0x1a8] sm:$0xf0] }
  0xa9   :  { %v516_v26 = vadd.f32 %v515_v21, %v502_v24  ;;  %v542_v27 = vadd.f32 %v541_v23, %v528_v25  ;;  %v1904_v21 = vor.u32 %v2054_v16, %v1901_v18  ;;  %v1871_v23 = vld [vmem:[%s2878_s11 + $0x150] sm:$0xf]  ;;  %v2050_v24 = vld [vmem:[%s2878_s11 + $0x168] sm:$0xf0]  ;;  %v2047_v25 = vld [vmem:[%s2878_s11 + $0x154] sm:$0xf]  ;;  %v1768_v16 = vor.u32 %v2023_v11, %v1767_v10 }
  0xaa   :  { %1242 = vmatpush.bf16.msrb.mxu2 %v1900_v17  ;;  %v1867_v11 = vld [vmem:[%s2878_s11 + $0x130] sm:$0xf] }
  0xab   :  { %1256 = vmatpush.bf16.msra.mxu3 %v1904_v21  ;;  %v1731_v21 = vld [vmem:[%s2878_s11 + $0x38] sm:$0xf] }
  0xae   :  { %v529_v22 = vpop.f32.mrf.mxu2 }
  0xaf   :  { %v530_v32 = vadd.f32 %v529_v22, %v516_v26  ;;  %v543_v33 = vpop.f32.mrf.mxu3  ;;  %v1908_v22 = vor.u32 %v2058_v20, %v1907_v19  ;;  %v1872_v26 = vor.u32 %v2050_v24, %v1871_v23  ;;  %v2012_v23 = vld [vmem:[%s2878_s11 + $0x3c] sm:$0xf] }
  0xb1   :  { %v544_v35 = vadd.f32 %v543_v33, %v530_v32  ;;  %1270 = vmatpush.bf16.msrb.mxu1 %v1908_v22  ;;  %v1843_v32 = vld [vmem:[%s2878_s11 + $0x118] sm:$0xf]  ;;  %v2043_v33 = vld [vmem:[%s2878_s11 + $0x130] sm:$0xf0]  ;;  %1243 = vmatpush.bf16.msrb.mxu2 %v1872_v26  ;;  %v1739_v26 = vld [vmem:[%s2878_s11 + $0x40] sm:$0xf] }
  0xb2   :  { %v2015_v22 = vld [vmem:[%s2878_s11 + $0x50] sm:$0xf0] }
  0xb3   :  { %v1732_v24 = vor.u32 %v2015_v22, %v1731_v21 }
  0xb6   :  { %v583_v30 = vpop.f32.mrf.mxu2 }
  0xbe   :  { %v555_v28 = vpop.f32.mrf.mxu0  ;;  %v585_v41 = vpop.f32.mrf.mxu2 }
  0xbf   :  { %v569_v29 = vpop.f32.mrf.mxu1  ;;  %v556_v31 = vadd.f32 %v555_v28, %v542_v27  ;;  %v1873_v27 = vld [vmem:[%s2878_s11 + $0x16c] sm:$0xf0]  ;;  %v1879_v28 = vld [vmem:[%s2878_s11 + $0x158] sm:$0xf] }
  0xc1   :  { %v570_v34 = vadd.f32 %v569_v29, %v556_v31  ;;  %v2051_v29 = vld [vmem:[%s2878_s11 + $0x170] sm:$0xf0] }
  0xc2   :  { %v1880_v31 = vor.u32 %v2051_v29, %v1879_v28 }
  0xc3   :  { %v584_v38 = vadd.f32 %v583_v30, %v570_v34  ;;  %v1876_v30 = vor.u32 %v2047_v25, %v1873_v27  ;;  %v2040_v34 = vld [vmem:[%s2878_s11 + $0x11c] sm:$0xf]  ;;  %v1733_v25 = vld [vmem:[%s2878_s11 + $0x54] sm:$0xf0] }
  0xc4   :  { %1271 = vmatpush.bf16.msrb.mxu1 %v1880_v31  ;;  %v2016_v27 = vld [vmem:[%s2878_s11 + $0x58] sm:$0xf0]  ;;  %v1736_v28 = vor.u32 %v2012_v23, %v1733_v25  ;;  %v1825_v31 = vld [vmem:[%s2878_s11 + $0x104] sm:$0xf0]  ;;  %v1839_v23 = vld [vmem:[%s2878_s11 + $0xf8] sm:$0xf] }
  0xc5   :  { %2066 = vtanh.f32 %v584_v38  ;;  %v1844_v38 = vor.u32 %v2043_v33, %v1843_v32  ;;  %1257 = vmatpush.bf16.msra.mxu3 %v1876_v30  ;;  %v1740_v29 = vor.u32 %v2016_v27, %v1739_v26  ;;  %v2034_v30 = vld [vmem:[%s2878_s11 + $0xec] sm:$0xf]  ;;  %v1703_v33 = vld [vmem:[%s2878_s11] sm:$0xf]  ;;  %v1803_v26 = vld [vmem:[%s2878_s11 + $0xb8] sm:$0xf] }
  0xc6   :  { %v557_v36 = vpop.f32.mrf.mxu0  ;;  %v1828_v32 = vor.u32 %v2034_v30, %v1825_v31  ;;  %v2031_v27 = vld [vmem:[%s2878_s11 + $0xd0] sm:$0xf0]  ;;  %v1805_v30 = vld [vmem:[%s2878_s11 + $0xd4] sm:$0xf0]  ;;  %v1811_v31 = vld [vmem:[%s2878_s11 + $0xc0] sm:$0xf] }
  0xc7   :  { %v558_v37 = vadd.f32 %v557_v36, %v544_v35  ;;  %v571_v39 = vpop.f32.mrf.mxu1  ;;  %v1845_v35 = vld [vmem:[%s2878_s11 + $0x134] sm:$0xf0]  ;;  %v1851_v36 = vld [vmem:[%s2878_s11 + $0x120] sm:$0xf]  ;;  %1244 = vmatpush.bf16.msrb.mxu2 %v1844_v38  ;;  %v1711_v38 = vld [vmem:[%s2878_s11 + $0x8] sm:$0xf] }
  0xc9   :  { %v572_v40 = vadd.f32 %v571_v39, %v558_v37  ;;  %v2044_v37 = vld [vmem:[%s2878_s11 + $0x138] sm:$0xf0]  ;;  %v1815_v39 = vld [vmem:[%s2878_s11 + $0xe0] sm:$0xf] }
  0xcb   :  { %v586_v42 = vadd.f32 %v585_v41, %v572_v40  ;;  %v2067_v43 = vpop.eup %2066  ;;  %v2036_v40 = vld [vmem:[%s2878_s11 + $0xf8] sm:$0xf0]  ;;  %v1848_v41 = vor.u32 %v2040_v34, %v1845_v35  ;;  %v2005_v35 = vld [vmem:[%s2878_s11 + $0x4] sm:$0xf] }
  0xcc   :  { %v1816_v51 = vor.u32 %v2036_v40, %v1815_v39  ;;  %v2008_v34 = vld [vmem:[%s2878_s11 + $0x18] sm:$0xf0]  ;;  %v2009_v39 = vld [vmem:[%s2878_s11 + $0x20] sm:$0xf0] }
  0xcd   :  { %2068 = vtanh.f32 %v586_v42  ;;  %v1852_v42 = vor.u32 %v2044_v37, %v1851_v36  ;;  %1258 = vmatpush.bf16.msra.mxu3 %v1848_v41  ;;  %v1704_v36 = vor.u32 %v2008_v34, %v1703_v33  ;;  %v1705_v37 = vld [vmem:[%s2878_s11 + $0x1c] sm:$0xf0]  ;;  %v1712_v41 = vor.u32 %v2009_v39, %v1711_v38  ;;  %v1783_v39 = vld [vmem:[%s2878_s11 + $0x88] sm:$0xf] }
  0xce   :  { %1245 = vmatpush.bf16.msrb.mxu2 %v1816_v51  ;;  %v1708_v40 = vor.u32 %v2005_v35, %v1705_v37  ;;  %v1923_v51 = vld [vmem:[%s2878_s11 + $0x1a0] sm:$0xf]  ;;  %v2021_v37 = vld [vmem:[%s2878_s11 + $0x84] sm:$0xf] }
  0xcf   :  { %1272 = vmatpush.bf16.msrb.mxu1 %v1852_v42  ;;  %v2027_v42 = vld [vmem:[%s2878_s11 + $0xb4] sm:$0xf]  ;;  %v1775_v35 = vld [vmem:[%s2878_s11 + $0x80] sm:$0xf] }
  0xd0   :  { %v1777_v38 = vld [vmem:[%s2878_s11 + $0x9c] sm:$0xf0] }
  0xd3   :  { %v2069_v44 = vpop.eup %2068 }
  0xd4   :  { %v590_v45 = vpack.c.bf16 %v2069_v44, %v2067_v43  ;;  %v2033_v43 = vld [vmem:[%s2878_s11 + $0xe4] sm:$0xf]  ;;  %v2055_v44 = vld [vmem:[%s2878_s11 + $0x194] sm:$0xf] }
  0xd6   :  { %667 = vmatmul.bf16.vlgmr.msrb.gmra.mxu3 %v590_v45  ;;  %v1909_v45 = vld [vmem:[%s2878_s11 + $0x1ac] sm:$0xf0] }
  0xd7   :  { %v1912_v49 = vor.u32 %v2055_v44, %v1909_v45  ;;  %v1915_v44 = vld [vmem:[%s2878_s11 + $0x198] sm:$0xf] }
  0xd9   :  { %1284 = vmatpush.bf16.msrb.mxu0 %v1912_v49 }
 0x159   :  { %v668_v53 = vpop.f32.mrf.mxu3 }
 0x15a   :  { %v669_v55 = vadd.f32 %v2062_v54, %v668_v53  ;;  %v2029_v53 = vld [vmem:[%s2878_s11 + $0xc0] sm:$0xf0] }
 0x15c   :  { %2070 = vtanh.f32 %v669_v55 }
 0x161   :  { %v670_v56 = vpop.f32.mrf.mxu3 }
 0x162   :  { %v671_v57 = vadd.f32 %v2062_v54, %v670_v56  ;;  %v2071_v58 = vpop.eup %2070  ;;  %v1881_v54 = vld [vmem:[%s2878_s11 + $0x174] sm:$0xf0]  ;;  %v1820_v56 = vor.u32 %v2033_v43, %v1817_v46  ;;  %v1797_v43 = vld [vmem:[%s2878_s11 + $0xcc] sm:$0xf0]  ;;  %v2059_v46 = vld [vmem:[%s2878_s11 + $0x1b0] sm:$0xf0] }
 0x163   :  { %v1884_v61 = vor.u32 %v2048_v50, %v1881_v54  ;;  %v1800_v45 = vor.u32 %v2027_v42, %v1797_v43  ;;  %v1916_v49 = vor.u32 %v2059_v46, %v1915_v44  ;;  %v2020_v54 = vld [vmem:[%s2878_s11 + $0x7c] sm:$0xf]  ;;  %v1780_v42 = vor.u32 %v2021_v37, %v1777_v38  ;;  %v1747_v43 = vld [vmem:[%s2878_s11 + $0x48] sm:$0xf]  ;;  %v2014_v46 = vld [vmem:[%s2878_s11 + $0x4c] sm:$0xf] }
 0x164   :  { %2072 = vtanh.f32 %v671_v57  ;;  %v1824_v57 = vor.u32 %v2037_v48, %v1823_v47  ;;  %1259 = vmatpush.bf16.msra.mxu3 %v1820_v56  ;;  %v2056_v47 = vld [vmem:[%s2878_s11 + $0x19c] sm:$0xf]  ;;  %v1917_v48 = vld [vmem:[%s2878_s11 + $0x1b4] sm:$0xf0]  ;;  %v1887_v56 = vld [vmem:[%s2878_s11 + $0x160] sm:$0xf] }
 0x165   :  { %1285 = vmatpush.bf16.msrb.mxu0 %v1884_v61  ;;  %v1920_v50 = vor.u32 %v2056_v47, %v1917_v48  ;;  %v1749_v47 = vld [vmem:[%s2878_s11 + $0x64] sm:$0xf0]  ;;  %v1755_v48 = vld [vmem:[%s2878_s11 + $0x50] sm:$0xf] }
 0x166   :  { %1273 = vmatpush.bf16.msrb.mxu1 %v1824_v57 }
 0x16a   :  { %v2073_v59 = vpop.eup %2072 }
 0x16b   :  { %v675_v60 = vpack.c.bf16 %v2073_v59, %v2071_v58  ;;  %v2026_v58 = vld [vmem:[%s2878_s11 + $0xac] sm:$0xf]  ;;  %v1789_v59 = vld [vmem:[%s2878_s11 + $0xc4] sm:$0xf0] }
 0x16d   :  { %1651 = vmatmul.msk.bf16.vlgmr.msra.gmra.mxu2 %vm712_vm1, %v675_v60  ;;  %v1795_v60 = vld [vmem:[%s2878_s11 + $0xb0] sm:$0xf] }
 0x1f0   :  { %v725_v3 = vpop.f32.mrf.mxu2 }
 0x1f1   :  { %v726_v4 = vadd.f32 %v2063_v2, %v725_v3  ;;  %v1856_v3 = vor.u32 %v2041_v63, %v1853_v0  ;;  %v1895_v63 = vld [vmem:[%s2878_s11 + $0x168] sm:$0xf]  ;;  %v2053_v0 = vld [vmem:[%s2878_s11 + $0x180] sm:$0xf0] }
 0x1f3   :  { %2074 = vtanh.f32 %v726_v4  ;;  %v1792_v4 = vor.u32 %v2026_v58, %v1789_v59  ;;  %1286 = vmatpush.bf16.msrb.mxu0 %v1856_v3  ;;  %v2052_v58 = vld [vmem:[%s2878_s11 + $0x178] sm:$0xf0]  ;;  %v2049_v59 = vld [vmem:[%s2878_s11 + $0x164] sm:$0xf]  ;;  %v1741_v3 = vld [vmem:[%s2878_s11 + $0x5c] sm:$0xf0] }
 0x1f4   :  { %v1888_v61 = vor.u32 %v2052_v58, %v1887_v56  ;;  %v1721_v56 = vld [vmem:[%s2878_s11 + $0x2c] sm:$0xf0]  ;;  %v2011_v58 = vld [vmem:[%s2878_s11 + $0x30] sm:$0xf0] }
 0x1f5   :  { %1260 = vmatpush.bf16.msra.mxu3 %v1792_v4  ;;  %v1859_v4 = vld [vmem:[%s2878_s11 + $0x128] sm:$0xf] }
 0x1f7   :  { %1287 = vmatpush.bf16.msrb.mxu0 %v1828_v32  ;;  %v2032_v32 = vld [vmem:[%s2878_s11 + $0xd8] sm:$0xf0] }
 0x1f8   :  { %v727_v5 = vpop.f32.mrf.mxu2  ;;  %v1812_v34 = vor.u32 %v2032_v32, %v1811_v31 }
 0x1f9   :  { %v2075_v6 = vpop.eup %2074  ;;  %v728_v7 = vadd.f32 %v2063_v2, %v727_v5  ;;  %v1788_v2 = vor.u32 %v2029_v53, %v1787_v52  ;;  %v1796_v5 = vor.u32 %v2030_v62, %v1795_v60  ;;  %v2060_v52 = vld [vmem:[%s2878_s11 + $0x1b8] sm:$0xf0]  ;;  %v1889_v60 = vld [vmem:[%s2878_s11 + $0x17c] sm:$0xf0] }
 0x1fa   :  { %1354 = vst [vmem:[%s2875_s13] sm:$0xff] %v2075_v6  ;;  %v1924_v53 = vor.u32 %v2060_v52, %v1923_v51  ;;  %v1892_v62 = vor.u32 %v2049_v59, %v1889_v60  ;;  %v1752_v51 = vor.u32 %v2014_v46, %v1749_v47  ;;  %v1719_v52 = vld [vmem:[%s2878_s11 + $0x10] sm:$0xf] }
 0x1fb   :  { %2076 = vtanh.f32 %v728_v7  ;;  %v2022_v7 = vld [vmem:[%s2878_s11 + $0x88] sm:$0xf0]  ;;  %1246 = vmatpush.bf16.msrb.mxu2 %v1788_v2  ;;  %1274 = vmatpush.bf16.msrb.mxu1 %v1796_v5  ;;  %v2013_v2 = vld [vmem:[%s2878_s11 + $0x44] sm:$0xf] }
 0x1fc   :  { %1288 = vmatpush.bf16.msrb.mxu0 %v1800_v45  ;;  %v1744_v5 = vor.u32 %v2013_v2, %v1741_v3  ;;  %v2017_v45 = vld [vmem:[%s2878_s11 + $0x60] sm:$0xf0] }
 0x1ff   :  { %1275 = vmatpush.bf16.msrb.mxu1 %v1768_v16  ;;  %v1831_v16 = vld [vmem:[%s2878_s11 + $0xf0] sm:$0xf] }
 0x201   :  { %v2077_v8 = vpop.eup %2076 }
 0x202   :  { %1355 = vst [vmem:[%s2875_s13 + $0x8] sm:$0xff] %v2077_v8  ;;  %v732_v9 = vpack.c.bf16 %v2077_v8, %v2075_v6  ;;  %v1759_v6 = vld [vmem:[%s2878_s11 + $0x70] sm:$0xf]  ;;  %v2019_v8 = vld [vmem:[%s2878_s11 + $0x74] sm:$0xf] }
 0x203   :  { %v1760_v13 = vor.u32 %v2022_v7, %v1759_v6  ;;  %1276 = vmatpush.bf16.msrb.mxu1 %v1740_v29  ;;  %v2045_v6 = vld [vmem:[%s2878_s11 + $0x140] sm:$0xf0]  ;;  %v2042_v7 = vld [vmem:[%s2878_s11 + $0x12c] sm:$0xf]  ;;  %v1804_v29 = vor.u32 %v2031_v27, %v1803_v26 }
 0x204   :  { %809 = vmatmul.bf16.vlgmr.msra.gmra.mxu0 %v732_v9  ;;  %v1761_v9 = vld [vmem:[%s2878_s11 + $0x8c] sm:$0xf0] }
 0x205   :  { %v1764_v15 = vor.u32 %v2019_v8, %v1761_v9  ;;  %1247 = vmatpush.bf16.msrb.mxu2 %v1760_v13  ;;  %v1861_v8 = vld [vmem:[%s2878_s11 + $0x144] sm:$0xf0]  ;;  %v1860_v9 = vor.u32 %v2045_v6, %v1859_v4  ;;  %v2813_v6 = vld [vmem:[%s2879_s12] sm:$0x7f] }
 0x206   :  { %v1864_v10 = vor.u32 %v2042_v7, %v1861_v8  ;;  %v942_v7 = vperm.slane %v2813_v6, 2  ;;  %v943_v8 = vperm.slane %v2813_v6, 3  ;;  %v946_v27 = vperm.slane %v2813_v6, 6 }
 0x207   :  { %1261 = vmatpush.bf16.msra.mxu3 %v1764_v15  ;;  %1277 = vmatpush.bf16.msrb.mxu1 %v1712_v41  ;;  %v1713_v15 = vld [vmem:[%s2878_s11 + $0x24] sm:$0xf0]  ;;  %v945_v37 = vperm.slane %v2813_v6, 5 }
 0x209   :  { %1248 = vmatpush.bf16.msrb.mxu2 %v1732_v24  ;;  %v2039_v24 = vld [vmem:[%s2878_s11 + $0x110] sm:$0xf0] }
 0x20a   :  { %v1840_v25 = vor.u32 %v2039_v24, %v1839_v23 }
 0x20b   :  { %1262 = vmatpush.bf16.msra.mxu3 %v1736_v28  ;;  %v2028_v28 = vld [vmem:[%s2878_s11 + $0xbc] sm:$0xf] }
 0x20c   :  { %v1808_v33 = vor.u32 %v2028_v28, %v1805_v30 }
 0x20d   :  { %1249 = vmatpush.bf16.msrb.mxu2 %v1704_v36  ;;  %v2024_v36 = vld [vmem:[%s2878_s11 + $0x98] sm:$0xf0] }
 0x20e   :  { %v1776_v41 = vor.u32 %v2024_v36, %v1775_v35  ;;  %v944_v36 = vperm.slane %v2813_v6, 4 }
 0x20f   :  { %1263 = vmatpush.bf16.msra.mxu3 %v1708_v40  ;;  %v2025_v40 = vld [vmem:[%s2878_s11 + $0xa0] sm:$0xf0] }
 0x210   :  { %v1784_v44 = vor.u32 %v2025_v40, %v1783_v39 }
 0x211   :  { %1298 = vmatpush.bf16.msra.mxu2 %v1916_v49  ;;  %v2018_v49 = vld [vmem:[%s2878_s11 + $0x68] sm:$0xf0] }
 0x213   :  { %1312 = vmatpush.bf16.msrb.mxu3 %v1920_v50  ;;  %v1748_v50 = vor.u32 %v2017_v45, %v1747_v43 }
 0x215   :  { %1299 = vmatpush.bf16.msra.mxu2 %v1888_v61 }
 0x217   :  { %1313 = vmatpush.bf16.msrb.mxu3 %v1892_v62 }
 0x219   :  { %1300 = vmatpush.bf16.msra.mxu2 %v1860_v9 }
 0x21b   :  { %1314 = vmatpush.bf16.msrb.mxu3 %v1864_v10 }
 0x281   :  { %v810_v55 = vpop.f32.mrf.mxu0 }
 0x282   :  { %v811_v12 = vadd.f32 %v2064_v1, %v810_v55  ;;  %v1769_v55 = vld [vmem:[%s2878_s11 + $0x94] sm:$0xf0] }
 0x283   :  { %v1772_v57 = vor.u32 %v2020_v54, %v1769_v55  ;;  %v2010_v54 = vld [vmem:[%s2878_s11 + $0x28] sm:$0xf0]  ;;  %v2007_v55 = vld [vmem:[%s2878_s11 + $0x14] sm:$0xf] }
 0x284   :  { %2078 = vtanh.f32 %v811_v12  ;;  %v2046_v12 = vld [vmem:[%s2878_s11 + $0x148] sm:$0xf0]  ;;  %v1720_v59 = vor.u32 %v2010_v54, %v1719_v52  ;;  %v1724_v60 = vor.u32 %v2007_v55, %v1721_v56 }
 0x285   :  { %1289 = vmatpush.bf16.msrb.mxu0 %v1772_v57  ;;  %v1868_v13 = vor.u32 %v2046_v12, %v1867_v11  ;;  %v1727_v57 = vld [vmem:[%s2878_s11 + $0x18] sm:$0xf] }
 0x286   :  { %v1728_v62 = vor.u32 %v2011_v58, %v1727_v57 }
 0x289   :  { %v812_v14 = vpop.f32.mrf.mxu0  ;;  %1290 = vmatpush.bf16.msrb.mxu0 %v1744_v5 }
 0x28a   :  { %v813_v17 = vadd.f32 %v2064_v1, %v812_v14  ;;  %v2079_v18 = vpop.eup %2078  ;;  %v1896_v1 = vor.u32 %v2053_v0, %v1895_v63  ;;  %v2006_v14 = vld [vmem:[%s2878_s11 + $0xc] sm:$0xf]  ;;  %v2065_v63 = vld [vmem:[%s2876_s10] ss:$0 sm:$0xff] }
 0x28c   :  { %2080 = vtanh.f32 %v813_v17  ;;  %v1716_v17 = vor.u32 %v2006_v14, %v1713_v15  ;;  %v941_v14 = vperm.slane %v2813_v6, 1 }
 0x28e   :  { %1291 = vmatpush.bf16.msrb.mxu0 %v1716_v17 }
 0x292   :  { %v2081_v19 = vpop.eup %2080 }
 0x293   :  { %v817_v20 = vpack.c.bf16 %v2081_v19, %v2079_v18  ;;  %v2038_v18 = vld [vmem:[%s2878_s11 + $0x108] sm:$0xf0]  ;;  %v2035_v19 = vld [vmem:[%s2878_s11 + $0xf4] sm:$0xf] }
 0x294   :  { %v1832_v21 = vor.u32 %v2038_v18, %v1831_v16 }
 0x295   :  { %1700 = vmatmul.msk.bf16.vlgmr.msra.gmra.mxu1 %vm712_vm1, %v817_v20  ;;  %v1833_v20 = vld [vmem:[%s2878_s11 + $0x10c] sm:$0xf0] }
 0x296   :  { %1326 = vmatpush.bf16.msra.mxu1 %v1924_v53  ;;  %v1836_v22 = vor.u32 %v2035_v19, %v1833_v20  ;;  %1301 = vmatpush.bf16.msra.mxu2 %v1832_v21  ;;  %v1756_v53 = vor.u32 %v2018_v49, %v1755_v48 }
 0x298   :  { %1315 = vmatpush.bf16.msrb.mxu3 %v1836_v22 }
 0x29a   :  { %1327 = vmatpush.bf16.msra.mxu1 %v1896_v1  ;;  %1302 = vmatpush.bf16.msra.mxu2 %v1804_v29 }
 0x29c   :  { %1316 = vmatpush.bf16.msrb.mxu3 %v1808_v33 }
 0x29e   :  { %1328 = vmatpush.bf16.msra.mxu1 %v1868_v13  ;;  %1303 = vmatpush.bf16.msra.mxu2 %v1776_v41  ;;  %v940_v13 = vperm.slane %v2813_v6, 0 }
 0x2a0   :  { %1317 = vmatpush.bf16.msrb.mxu3 %v1780_v42 }
 0x2a2   :  { %1329 = vmatpush.bf16.msra.mxu1 %v1840_v25  ;;  %1304 = vmatpush.bf16.msra.mxu2 %v1748_v50 }
 0x2a4   :  { %1318 = vmatpush.bf16.msrb.mxu3 %v1752_v51 }
 0x2a6   :  { %1330 = vmatpush.bf16.msra.mxu1 %v1812_v34  ;;  %1305 = vmatpush.bf16.msra.mxu2 %v1720_v59 }
 0x2a8   :  { %1319 = vmatpush.bf16.msrb.mxu3 %v1724_v60 }
 0x2aa   :  { %1331 = vmatpush.bf16.msra.mxu1 %v1784_v44 }
 0x2ae   :  { %1332 = vmatpush.bf16.msra.mxu1 %v1756_v53 }
 0x2b2   :  { %1333 = vmatpush.bf16.msra.mxu1 %v1728_v62 }
 0x312   :  { %v866_v61 = vpop.f32.mrf.mxu1 }
 0x313   :  { %v867_v0 = vadd.f32 %v2065_v63, %v866_v61 }
 0x315   :  { %2082 = vtanh.f32 %v867_v0 }
 0x31a   :  { %v868_v1 = vpop.f32.mrf.mxu1 }
 0x31b   :  { %v869_v2 = vadd.f32 %v2065_v63, %v868_v1  ;;  %v2083_v3 = vpop.eup %2082 }
 0x31d   :  { %2084 = vtanh.f32 %v869_v2 }
 0x323   :  { %v2085_v4 = vpop.eup %2084 }
 0x324   :  { %v873_v5 = vpack.c.bf16 %v2085_v4, %v2083_v3 }
 0x326   :  { %1250 = vmatmul.bf16.vlgmr.msrb.gmra.mxu2 %v873_v5  ;;  %1264 = vmatmul.bf16.vlgmr.msra.gmra.mxu3 %v873_v5 }
 0x327   :  { %1278 = vmatmul.bf16.vlgmr.msrb.gmra.mxu1 %v873_v5  ;;  %1292 = vmatmul.bf16.vlgmr.msrb.gmra.mxu0 %v873_v5 }
 0x336   :  { %1306 = vmatmul.bf16.vlgmr.msra.gmra.mxu2 %v873_v5  ;;  %1320 = vmatmul.bf16.vlgmr.msrb.gmra.mxu3 %v873_v5 }
 0x337   :  { %1334 = vmatmul.bf16.vlgmr.msra.gmra.mxu1 %v873_v5 }
 0x3a4   :  { %v1279_v9 = vpop.f32.mrf.mxu1  ;;  %v1293_v10 = vpop.f32.mrf.mxu0 }
 0x3a5   :  { %v1280_v11 = vadd.f32 %v1279_v9, %v942_v7  ;;  %v1294_v12 = vadd.f32 %v1293_v10, %v943_v8 }
 0x3a7   :  { %2086 = vtanh.f32 %v1280_v11 }
 0x3a8   :  { %2088 = vtanh.f32 %v1294_v12 }
 0x3a9   :  { %v1251_v15 = vpop.f32.mrf.mxu2  ;;  %v1265_v16 = vpop.f32.mrf.mxu3 }
 0x3aa   :  { %v1252_v17 = vadd.f32 %v1251_v15, %v940_v13  ;;  %v1266_v18 = vadd.f32 %v1265_v16, %v941_v14 }
 0x3ac   :  { %2090 = vtanh.f32 %v1252_v17  ;;  %v1281_v19 = vpop.f32.mrf.mxu1  ;;  %v1295_v20 = vpop.f32.mrf.mxu0 }
 0x3ad   :  { %v2087_v21 = vpop.eup %2086  ;;  %2092 = vtanh.f32 %v1266_v18  ;;  %v1282_v22 = vadd.f32 %v1281_v19, %v942_v7  ;;  %v1296_v23 = vadd.f32 %v1295_v20, %v943_v8 }
 0x3ae   :  { %v2089_v24 = vpop.eup %2088  ;;  %1358 = vst [vmem:[%s2880_s14 + $0x10] sm:$0xff] %v2087_v21 }
 0x3af   :  { %1359 = vst [vmem:[%s2880_s14 + $0x18] sm:$0xff] %v2089_v24  ;;  %2094 = vtanh.f32 %v1282_v22 }
 0x3b0   :  { %2096 = vtanh.f32 %v1296_v23 }
 0x3b1   :  { %v1253_v25 = vpop.f32.mrf.mxu2  ;;  %v1267_v26 = vpop.f32.mrf.mxu3 }
 0x3b2   :  { %v2091_v28 = vpop.eup %2090  ;;  %v1254_v29 = vadd.f32 %v1253_v25, %v940_v13  ;;  %v1268_v30 = vadd.f32 %v1267_v26, %v941_v14 }
 0x3b3   :  { %v2093_v31 = vpop.eup %2092  ;;  %1356 = vst [vmem:[%s2880_s14] sm:$0xff] %v2091_v28 }
 0x3b4   :  { %1357 = vst [vmem:[%s2880_s14 + $0x8] sm:$0xff] %v2093_v31  ;;  %2098 = vtanh.f32 %v1254_v29  ;;  %v1335_v32 = vpop.f32.mrf.mxu1 }
 0x3b5   :  { %v2095_v33 = vpop.eup %2094  ;;  %2100 = vtanh.f32 %v1268_v30  ;;  %v1336_v34 = vadd.f32 %v1335_v32, %v946_v27 }
 0x3b6   :  { %v2097_v35 = vpop.eup %2096  ;;  %1365 = vst [vmem:[%s2880_s14 + $0x48] sm:$0xff] %v2095_v33 }
 0x3b7   :  { %1366 = vst [vmem:[%s2880_s14 + $0x50] sm:$0xff] %v2097_v35  ;;  %2102 = vtanh.f32 %v1336_v34 }
 0x3b9   :  { %v1307_v38 = vpop.f32.mrf.mxu2  ;;  %v1321_v39 = vpop.f32.mrf.mxu3 }
 0x3ba   :  { %v2099_v40 = vpop.eup %2098  ;;  %v1308_v41 = vadd.f32 %v1307_v38, %v944_v36  ;;  %v1322_v42 = vadd.f32 %v1321_v39, %v945_v37 }
 0x3bb   :  { %v2101_v43 = vpop.eup %2100  ;;  %1363 = vst [vmem:[%s2880_s14 + $0x38] sm:$0xff] %v2099_v40 }
 0x3bc   :  { %1364 = vst [vmem:[%s2880_s14 + $0x40] sm:$0xff] %v2101_v43  ;;  %2104 = vtanh.f32 %v1308_v41  ;;  %v1337_v44 = vpop.f32.mrf.mxu1 }
 0x3bd   :  { %v2103_v45 = vpop.eup %2102  ;;  %2106 = vtanh.f32 %v1322_v42  ;;  %v1338_v46 = vadd.f32 %v1337_v44, %v946_v27 }
 0x3be   :  { %1362 = vst.msk [vmem:[%s2880_s14 + $0x30] sm:$0xff] %vm486_vm0, %v2103_v45 }
 0x3bf   :  { %2108 = vtanh.f32 %v1338_v46 }
 0x3c1   :  { %v1309_v47 = vpop.f32.mrf.mxu2  ;;  %v1323_v48 = vpop.f32.mrf.mxu3 }
 0x3c2   :  { %v2105_v49 = vpop.eup %2104  ;;  %v1310_v50 = vadd.f32 %v1309_v47, %v944_v36  ;;  %v1324_v51 = vadd.f32 %v1323_v48, %v945_v37 }
 0x3c3   :  { %v2107_v52 = vpop.eup %2106  ;;  %1360 = vst [vmem:[%s2880_s14 + $0x20] sm:$0xff] %v2105_v49 }
 0x3c4   :  { %1361 = vst [vmem:[%s2880_s14 + $0x28] sm:$0xff] %v2107_v52  ;;  %2110 = vtanh.f32 %v1310_v50 }
 0x3c5   :  { %v2109_v53 = vpop.eup %2108  ;;  %2112 = vtanh.f32 %v1324_v51 }
 0x3c6   :  { %1369 = vst.msk [vmem:[%s2880_s14 + $0x68] sm:$0xff] %vm486_vm0, %v2109_v53 }
 0x3ca   :  { %v2111_v54 = vpop.eup %2110 }
 0x3cb   :  { %v2113_v55 = vpop.eup %2112  ;;  %1367 = vst [vmem:[%s2880_s14 + $0x58] sm:$0xff] %v2111_v54 }
 0x3cc   :  { %1368 = vst [vmem:[%s2880_s14 + $0x60] sm:$0xff] %v2113_v55 }

</bundles_post_ra>
